<compile_context>
chip_gen: v5e
topology: v5e:2x2
jax: 0.10.0
libtpu: 0.0.40
codegen_flags: <defaults>
</compile_context>

<pallas_src>
import jax
import jax.numpy as jnp
from jax.experimental import pallas as pl
from jax.experimental.pallas import tpu as pltpu


# ---------------------------------------------------------------------------
# Kernels
# ---------------------------------------------------------------------------

def _critic_kernel_fused(state_ref, action_ref, ws_ref, wa_ref,
                         wh_ref, wo_ref, b_ref, q_ref):
    """Fused twin-Q forward, layer-2 as one block-diagonal (2H, 2H) matmul.

    state_ref : (TB, state_dim)   f32
    action_ref: (TB, action_dim)  f32
    ws_ref    : (state_dim, 2H)   bf16  state rows of [W1 | W4]
    wa_ref    : (action_dim, 2H)  bf16  action rows of [W1 | W4]
    wh_ref    : (2H, 2H)          bf16  block-diag(W2, W5)
    wo_ref    : (2H, 2)           bf16  [[w3, 0], [0, w6]]
    b_ref     : (3, 2H)           f32   row0=[b1|b4], row1=[b2|b5], row2=[b3,b6,0...]
    q_ref     : (TB, 2)           f32   [q1 | q2]
    """
    # In-kernel bf16 cast: MXU is bf16-native; accumulation stays f32.
    s = state_ref[...].astype(jnp.bfloat16)
    a = action_ref[...].astype(jnp.bfloat16)

    b_in = b_ref[0:1, :]           # (1, 2H)
    b_hid = b_ref[1:2, :]          # (1, 2H)
    b_out = b_ref[2:3, 0:2]        # (1, 2)

    # Layer 1 (both heads): x @ [W1|W4] + [b1|b4], without materializing x.
    h = (jnp.dot(s, ws_ref[...], preferred_element_type=jnp.float32)
         + jnp.dot(a, wa_ref[...], preferred_element_type=jnp.float32)
         + b_in)
    h = jnp.maximum(h, 0.0).astype(jnp.bfloat16)

    # Layer 2 (both heads): block-diagonal weight keeps heads independent.
    g = jnp.dot(h, wh_ref[...], preferred_element_type=jnp.float32) + b_hid
    g = jnp.maximum(g, 0.0).astype(jnp.bfloat16)

    # Layer 3 (both heads): single (2H, 2) matmul -> lane-packed [q1 | q2].
    q = jnp.dot(g, wo_ref[...], preferred_element_type=jnp.float32) + b_out
    q_ref[...] = q.astype(q_ref.dtype)


def _critic_kernel_split(state_ref, action_ref, ws_ref, wa_ref,
                         w2_ref, w5_ref, wo_ref, b_ref, q_ref):
    """Same forward, but layer-2 as two (H, H) matmuls (used when 2H > 128)."""
    H = w2_ref.shape[0]

    s = state_ref[...].astype(jnp.bfloat16)
    a = action_ref[...].astype(jnp.bfloat16)

    b_in = b_ref[0:1, :]
    b_hid = b_ref[1:2, :]
    b_out = b_ref[2:3, 0:2]

    h = (jnp.dot(s, ws_ref[...], preferred_element_type=jnp.float32)
         + jnp.dot(a, wa_ref[...], preferred_element_type=jnp.float32)
         + b_in)
    h = jnp.maximum(h, 0.0).astype(jnp.bfloat16)

    g1 = jnp.dot(h[:, :H], w2_ref[...], preferred_element_type=jnp.float32) + b_hid[:, :H]
    g2 = jnp.dot(h[:, H:], w5_ref[...], preferred_element_type=jnp.float32) + b_hid[:, H:]
    g = jnp.concatenate([jnp.maximum(g1, 0.0), jnp.maximum(g2, 0.0)],
                        axis=1).astype(jnp.bfloat16)

    q = jnp.dot(g, wo_ref[...], preferred_element_type=jnp.float32) + b_out
    q_ref[...] = q.astype(q_ref.dtype)


# ---------------------------------------------------------------------------
# Param init / packing
# ---------------------------------------------------------------------------

def init_critic_params(key, input_size, hidden_size):
    """Deterministic param init (PyTorch Linear-style uniform bounds).
    Weights are stored transposed: (in, out)."""
    def linear(k, fan_in, fan_out):
        kw, kb = jax.random.split(k)
        bound = 1.0 / jnp.sqrt(fan_in)
        w = jax.random.uniform(kw, (fan_in, fan_out), jnp.float32, -bound, bound)
        b = jax.random.uniform(kb, (1, fan_out), jnp.float32, -bound, bound)
        return w, b

    keys = jax.random.split(key, 6)
    params = {}
    params["w1"], params["b1"] = linear(keys[0], input_size, hidden_size)
    params["w2"], params["b2"] = linear(keys[1], hidden_size, hidden_size)
    params["w3"], params["b3"] = linear(keys[2], hidden_size, 1)
    params["w4"], params["b4"] = linear(keys[3], input_size, hidden_size)
    params["w5"], params["b5"] = linear(keys[4], hidden_size, 1 * hidden_size)
    params["w6"], params["b6"] = linear(keys[5], hidden_size, 1)
    return params


def pack_critic_params(params, state_dim, mxu_lane_width=128):
    """One-time packing of the 12 PyTorch-layout tensors into fused bf16 arrays.

    Block-diag layer-2 fusion only while 2H fits one MXU tile on all supported
    generations (128 wide on v5e; 256 on v6e/v7x -> use 128 as the safe bound).
    """
    mm_dt = jnp.bfloat16
    H = params["w1"].shape[1]
    fuse_hidden = (2 * H) <= mxu_lane_width

    w_in = jnp.concatenate([params["w1"], params["w4"]], axis=1)   # (in, 2H)
    packed = {
        "ws": w_in[:state_dim, :].astype(mm_dt),                   # (sd, 2H)
        "wa": w_in[state_dim:, :].astype(mm_dt),                   # (ad, 2H)
        "fuse": fuse_hidden,
    }

    if fuse_hidden:
        zH = jnp.zeros((H, H), jnp.float32)
        packed["wh"] = jnp.block([[params["w2"], zH],
                                  [zH, params["w5"]]]).astype(mm_dt)   # (2H, 2H)
    else:
        packed["w2"] = params["w2"].astype(mm_dt)                      # (H, H)
        packed["w5"] = params["w5"].astype(mm_dt)                      # (H, H)

    z1 = jnp.zeros((H, 1), jnp.float32)
    packed["wo"] = jnp.concatenate(
        [jnp.concatenate([params["w3"], z1], axis=1),
         jnp.concatenate([z1, params["w6"]], axis=1)], axis=0).astype(mm_dt)  # (2H, 2)

    b_in = jnp.concatenate([params["b1"], params["b4"]], axis=1)    # (1, 2H)
    b_hid = jnp.concatenate([params["b2"], params["b5"]], axis=1)   # (1, 2H)
    b_out = jnp.concatenate(
        [params["b3"], params["b6"],
         jnp.zeros((1, 2 * H - 2), jnp.float32)], axis=1)           # (1, 2H)
    packed["b"] = jnp.concatenate([b_in, b_hid, b_out], axis=0)     # (3, 2H) f32
    return packed


# ---------------------------------------------------------------------------
# Wrapper
# ---------------------------------------------------------------------------

def _round_up(x, m):
    return ((x + m - 1) // m) * m


def _resident_spec(arr):
    # Constant index_map: block index never changes across grid steps, so the
    # array is DMA'd once and stays VMEM-resident (no per-step re-fetch).
    return pl.BlockSpec(arr.shape, lambda i: (0, 0))


def critic_forward(packed, state, action, tile_b=512):
    """Matches Critic.forward(state, action) -> (q1, q2)."""
    B, sd = state.shape
    ad = action.shape[1]

    state = state.astype(jnp.float32)
    action = action.astype(jnp.float32)

    # Batch tile: large (>=256 preferred to fill the MXU M dimension), multiple
    # of 8, clamped to the (padded) batch for tiny test shapes.
    tb = int(min(tile_b, _round_up(B, 8)))
    Bp = _round_up(B, tb)
    if Bp != B:
        state = jnp.pad(state, ((0, Bp - B), (0, 0)))
        action = jnp.pad(action, ((0, Bp - B), (0, 0)))

    if packed["fuse"]:
        kernel = _critic_kernel_fused
        weights = (packed["ws"], packed["wa"], packed["wh"], packed["wo"], packed["b"])
    else:
        kernel = _critic_kernel_split
        weights = (packed["ws"], packed["wa"], packed["w2"], packed["w5"],
                   packed["wo"], packed["b"])

    in_specs = ([pl.BlockSpec((tb, sd), lambda i: (i, 0)),
                 pl.BlockSpec((tb, ad), lambda i: (i, 0))]
                + [_resident_spec(w) for w in weights])
    out_specs = pl.BlockSpec((tb, 2), lambda i: (i, 0))

    q = pl.pallas_call(
        kernel,
        out_shape=jax.ShapeDtypeStruct((Bp, 2), jnp.float32),
        grid=(Bp // tb,),
        in_specs=in_specs,
        out_specs=out_specs,
        compiler_params=pltpu.CompilerParams(
            # parallel batch axis -> sharded over the 2 TCs on v7x.
            dimension_semantics=("parallel",),
            # Above v5e's 16 MiB scoped default, within v7x's 64 MiB physical.
            vmem_limit_bytes=32 * 1024 * 1024,
        ),
    )(state, action, *weights)

    return q[:B, 0:1], q[:B, 1:2]


# ---------------------------------------------------------------------------
# Reference (f32, explicit highest precision — no global config reliance)
# ---------------------------------------------------------------------------

def critic_reference(params, state, action):
    hp = jax.lax.Precision.HIGHEST
    x = jnp.concatenate([state, action], axis=1).astype(jnp.float32)
    h = jnp.maximum(jnp.dot(x, params["w1"], precision=hp) + params["b1"], 0.0)
    h = jnp.maximum(jnp.dot(h, params["w2"], precision=hp) + params["b2"], 0.0)
    q1 = jnp.dot(h, params["w3"], precision=hp) + params["b3"]
    g = jnp.maximum(jnp.dot(x, params["w4"], precision=hp) + params["b4"], 0.0)
    g = jnp.maximum(jnp.dot(g, params["w5"], precision=hp) + params["b5"], 0.0)
    q2 = jnp.dot(g, params["w6"], precision=hp) + params["b6"]
    return q1, q2


# ---------------------------------------------------------------------------
# Self-test
# ---------------------------------------------------------------------------

if __name__ == "__main__":
    # Small shapes: batch=8, state_dim=24, action_dim=8 -> input_size=32, hidden=32
    batch, state_dim, action_dim, hidden = 8, 24, 8, 32
    input_size = state_dim + action_dim

    key = jax.random.PRNGKey(0)
    k_params, k_state, k_action, k_state2, k_action2 = jax.random.split(key, 5)

    params = init_critic_params(k_params, input_size, hidden)
    packed = pack_critic_params(params, state_dim)

    # bf16 MXU inputs with f32 accumulation vs. an f32-highest reference:
    # relaxed tolerance (structural bugs would produce O(1e-1)+ errors).
    atol = rtol = 5e-2

    # --- small batch (single grid step) ---
    state = jax.random.normal(k_state, (batch, state_dim), jnp.float32)
    action = jax.random.normal(k_action, (batch, action_dim), jnp.float32)
    q1, q2 = critic_forward(packed, state, action)
    q1 = jax.block_until_ready(q1)
    q2 = jax.block_until_ready(q2)
    r1, r2 = critic_reference(params, state, action)
    assert q1.shape == (batch, 1) and q2.shape == (batch, 1)
    assert jnp.allclose(q1, r1, atol=atol, rtol=rtol)
    assert jnp.allclose(q2, r2, atol=atol, rtol=rtol)

    # --- larger batch: exercises the multi-step batch grid with resident weights ---
    big = 1024
    state_b = jax.random.normal(k_state2, (big, state_dim), jnp.float32)
    action_b = jax.random.normal(k_action2, (big, action_dim), jnp.float32)
    qb1, qb2 = critic_forward(packed, state_b, action_b, tile_b=512)
    qb1 = jax.block_until_ready(qb1)
    qb2 = jax.block_until_ready(qb2)
    rb1, rb2 = critic_reference(params, state_b, action_b)
    assert qb1.shape == (big, 1) and qb2.shape == (big, 1)
    assert jnp.allclose(qb1, rb1, atol=atol, rtol=rtol)
    assert jnp.allclose(qb2, rb2, atol=atol, rtol=rtol)

    print("KERNEL_OK")
</pallas_src>

<mosaic_0001>
module attributes {stable_mosaic.version = 11 : i64} {
  func.func @_critic_kernel_fused(%arg0: i32, %arg1: memref<8x24xf32, #tpu.memory_space<vmem>>, %arg2: memref<8x8xf32, #tpu.memory_space<vmem>>, %arg3: memref<24x64xbf16, #tpu.memory_space<vmem>>, %arg4: memref<8x64xbf16, #tpu.memory_space<vmem>>, %arg5: memref<64x64xbf16, #tpu.memory_space<vmem>>, %arg6: memref<64x2xbf16, #tpu.memory_space<vmem>>, %arg7: memref<3x64xf32, #tpu.memory_space<vmem>>, %arg8: memref<8x2xf32, #tpu.memory_space<vmem>>) attributes {dimension_semantics = [#tpu.dimension_semantics<parallel>], iteration_bounds = array<i64: 1>, scalar_prefetch = 0 : i64, scratch_operands = 0 : i64, tpu.core_type = #tpu.core_type<tc>, window_params = [{transform_indices = @transform_0, window_bounds = array<i64: 8, 24>}, {transform_indices = @transform_1, window_bounds = array<i64: 8, 8>}, {pipeline_mode = #tpu.pipeline_mode<synchronous>, transform_indices = @transform_2, window_bounds = array<i64: 24, 64>}, {pipeline_mode = #tpu.pipeline_mode<synchronous>, transform_indices = @transform_3, window_bounds = array<i64: 8, 64>}, {pipeline_mode = #tpu.pipeline_mode<synchronous>, transform_indices = @transform_4, window_bounds = array<i64: 64, 64>}, {pipeline_mode = #tpu.pipeline_mode<synchronous>, transform_indices = @transform_5, window_bounds = array<i64: 64, 2>}, {pipeline_mode = #tpu.pipeline_mode<synchronous>, transform_indices = @transform_6, window_bounds = array<i64: 3, 64>}, {transform_indices = @transform_7, window_bounds = array<i64: 8, 2>}]} {
    %c0 = arith.constant 0 : index
    %c0_0 = arith.constant 0 : index
    %0 = vector.load %arg1[%c0, %c0_0] : memref<8x24xf32, #tpu.memory_space<vmem>>, vector<8x24xf32>
    %1 = arith.truncf %0 : vector<8x24xf32> to vector<8x24xbf16>
    %c0_1 = arith.constant 0 : index
    %c0_2 = arith.constant 0 : index
    %2 = vector.load %arg2[%c0_1, %c0_2] : memref<8x8xf32, #tpu.memory_space<vmem>>, vector<8x8xf32>
    %3 = arith.truncf %2 : vector<8x8xf32> to vector<8x8xbf16>
    %c0_3 = arith.constant 0 : index
    %c0_4 = arith.constant 0 : index
    %4 = vector.load %arg7[%c0_3, %c0_4] : memref<3x64xf32, #tpu.memory_space<vmem>>, vector<1x64xf32>
    %c1 = arith.constant 1 : index
    %c0_5 = arith.constant 0 : index
    %5 = vector.load %arg7[%c1, %c0_5] : memref<3x64xf32, #tpu.memory_space<vmem>>, vector<1x64xf32>
    %c2 = arith.constant 2 : index
    %c0_6 = arith.constant 0 : index
    %6 = vector.load %arg7[%c2, %c0_6] : memref<3x64xf32, #tpu.memory_space<vmem>>, vector<1x2xf32>
    %c0_7 = arith.constant 0 : index
    %c0_8 = arith.constant 0 : index
    %7 = vector.load %arg3[%c0_7, %c0_8] : memref<24x64xbf16, #tpu.memory_space<vmem>>, vector<24x64xbf16>
    %cst = arith.constant dense<0.000000e+00> : vector<8x64xf32>
    %8 = tpu.matmul %1, %7, %cst {dimension_numbers = #tpu.dot_dimension_numbers<[1], [0], [0], [1], [0, 0, 1, 1], [], []>} : vector<8x24xbf16>, vector<24x64xbf16>, vector<8x64xf32> -> vector<8x64xf32>
    %c0_9 = arith.constant 0 : index
    %c0_10 = arith.constant 0 : index
    %9 = vector.load %arg4[%c0_9, %c0_10] : memref<8x64xbf16, #tpu.memory_space<vmem>>, vector<8x64xbf16>
    %cst_11 = arith.constant dense<0.000000e+00> : vector<8x64xf32>
    %10 = tpu.matmul %3, %9, %cst_11 {dimension_numbers = #tpu.dot_dimension_numbers<[1], [0], [0], [1], [0, 0, 1, 1], [], []>} : vector<8x8xbf16>, vector<8x64xbf16>, vector<8x64xf32> -> vector<8x64xf32>
    %11 = arith.addf %8, %10 : vector<8x64xf32>
    %12 = vector.broadcast %4 : vector<1x64xf32> to vector<8x64xf32>
    %13 = arith.addf %11, %12 : vector<8x64xf32>
    %cst_12 = arith.constant 0.000000e+00 : f32
    %14 = vector.broadcast %cst_12 : f32 to vector<8x64xf32>
    %15 = arith.maximumf %13, %14 : vector<8x64xf32>
    %16 = arith.truncf %15 : vector<8x64xf32> to vector<8x64xbf16>
    %c0_13 = arith.constant 0 : index
    %c0_14 = arith.constant 0 : index
    %17 = vector.load %arg5[%c0_13, %c0_14] : memref<64x64xbf16, #tpu.memory_space<vmem>>, vector<64x64xbf16>
    %cst_15 = arith.constant dense<0.000000e+00> : vector<8x64xf32>
    %18 = tpu.matmul %16, %17, %cst_15 {dimension_numbers = #tpu.dot_dimension_numbers<[1], [0], [0], [1], [0, 0, 1, 1], [], []>} : vector<8x64xbf16>, vector<64x64xbf16>, vector<8x64xf32> -> vector<8x64xf32>
    %19 = vector.broadcast %5 : vector<1x64xf32> to vector<8x64xf32>
    %20 = arith.addf %18, %19 : vector<8x64xf32>
    %cst_16 = arith.constant 0.000000e+00 : f32
    %21 = vector.broadcast %cst_16 : f32 to vector<8x64xf32>
    %22 = arith.maximumf %20, %21 : vector<8x64xf32>
    %23 = arith.truncf %22 : vector<8x64xf32> to vector<8x64xbf16>
    %c0_17 = arith.constant 0 : index
    %c0_18 = arith.constant 0 : index
    %24 = vector.load %arg6[%c0_17, %c0_18] : memref<64x2xbf16, #tpu.memory_space<vmem>>, vector<64x2xbf16>
    %cst_19 = arith.constant dense<0.000000e+00> : vector<8x2xf32>
    %25 = tpu.matmul %23, %24, %cst_19 {dimension_numbers = #tpu.dot_dimension_numbers<[1], [0], [0], [1], [0, 0, 1, 1], [], []>} : vector<8x64xbf16>, vector<64x2xbf16>, vector<8x2xf32> -> vector<8x2xf32>
    %26 = vector.broadcast %6 : vector<1x2xf32> to vector<8x2xf32>
    %27 = arith.addf %25, %26 : vector<8x2xf32>
    %c0_20 = arith.constant 0 : index
    %c0_21 = arith.constant 0 : index
    %28 = vector.load %arg8[%c0_20, %c0_21] : memref<8x2xf32, #tpu.memory_space<vmem>>, vector<8x2xf32>
    tpu.vector_store %arg8[%c0_20, %c0_21], %27 {strides = array<i32>} : memref<8x2xf32, #tpu.memory_space<vmem>>, vector<8x2xf32>,
    return
  }
  func.func @transform_0(%arg0: i32) -> (i32, i32) {
    %c0_i32 = arith.constant 0 : i32
    %c0_i32_0 = arith.constant 0 : i32
    return %arg0, %c0_i32 : i32, i32
  }
  func.func @transform_1(%arg0: i32) -> (i32, i32) {
    %c0_i32 = arith.constant 0 : i32
    %c0_i32_0 = arith.constant 0 : i32
    return %arg0, %c0_i32 : i32, i32
  }
  func.func @transform_2(%arg0: i32) -> (i32, i32) {
    %c0_i32 = arith.constant 0 : i32
    %c0_i32_0 = arith.constant 0 : i32
    %c0_i32_1 = arith.constant 0 : i32
    return %c0_i32, %c0_i32_0 : i32, i32
  }
  func.func @transform_3(%arg0: i32) -> (i32, i32) {
    %c0_i32 = arith.constant 0 : i32
    %c0_i32_0 = arith.constant 0 : i32
    %c0_i32_1 = arith.constant 0 : i32
    return %c0_i32, %c0_i32_0 : i32, i32
  }
  func.func @transform_4(%arg0: i32) -> (i32, i32) {
    %c0_i32 = arith.constant 0 : i32
    %c0_i32_0 = arith.constant 0 : i32
    %c0_i32_1 = arith.constant 0 : i32
    return %c0_i32, %c0_i32_0 : i32, i32
  }
  func.func @transform_5(%arg0: i32) -> (i32, i32) {
    %c0_i32 = arith.constant 0 : i32
    %c0_i32_0 = arith.constant 0 : i32
    %c0_i32_1 = arith.constant 0 : i32
    return %c0_i32, %c0_i32_0 : i32, i32
  }
  func.func @transform_6(%arg0: i32) -> (i32, i32) {
    %c0_i32 = arith.constant 0 : i32
    %c0_i32_0 = arith.constant 0 : i32
    %c0_i32_1 = arith.constant 0 : i32
    return %c0_i32, %c0_i32_0 : i32, i32
  }
  func.func @transform_7(%arg0: i32) -> (i32, i32) {
    %c0_i32 = arith.constant 0 : i32
    %c0_i32_0 = arith.constant 0 : i32
    return %arg0, %c0_i32 : i32, i32
  }
}

</mosaic_0001>

<bundles_post_ra>
// kernel: tpu_custom_call.1
= control target key start
LH: loop header
LB: loop body
LE: loop exit
PB: predicated region body
PF: predicated region fallthrough
CT: control target
= control target key end

     0   :  { %12 = vsyncpa [#allocation3], 0  ;;  %s513_s0 = inlined_call_operand.hbm [shape: f32[8,24], index: 0, kind: input, shape index: {}]   ;;  %s514_s1 = inlined_call_operand.hbm [shape: f32[8,8], index: 1, kind: input, shape index: {}]   ;;  %s515_s2 = inlined_call_operand.hbm [shape: bf16[24,64], index: 2, kind: input, shape index: {}]   ;;  %s516_s3 = inlined_call_operand.hbm [shape: bf16[8,64], index: 3, kind: input, shape index: {}]   ;;  %s517_s4 = inlined_call_operand.vmem [shape: bf16[64,64], index: 4, kind: input, shape index: {}]   ;;  %s518_s5 = inlined_call_operand.vmem [shape: bf16[64,2], index: 5, kind: input, shape index: {}]   ;;  %s519_s6 = inlined_call_operand.vmem [shape: f32[3,64], index: 6, kind: input, shape index: {}]   ;;  %s520_s7 = inlined_call_operand.vmem [shape: f32[8,2], index: 7, kind: output, shape index: {}]  }
   0x1   :  { %13 = vsyncpa [#allocation5], 0  ;;  %s31_s26 = sshll.u32 %s514_s1, 4  ;;  %s32_s26 = int_to_ptr.hbm [resolvable:$true] %s31_s26 }
   0x2   :  { %14 = vsyncpa [#allocation8], 0  ;;  %s419_s27 = smov [#allocation4]   ;;  %s20_s8 = sshll.u32 %s513_s0, 4  ;;  %s21_s8 = int_to_ptr.hbm [resolvable:$true] %s20_s8 }
   0x3   :  { %s33_s28 = sshll.u32 %s419_s27, 4  ;;  %s420_s9 = smov [#allocation2]   ;;  %s34_s28 = int_to_ptr.vmem [resolvable:$true] %s33_s28 }
   0x4   :  { %36 = dma.hbm_to_vmem [thread:$0]  %s32_s26, 128, %s34_s28, [#allocation5]  }
   0x5   :  { %s22_s10 = sshll.u32 %s420_s9, 4  ;;  %s41_s13 = sshll.u32 %s515_s2, 4  ;;  %s23_s10 = int_to_ptr.vmem [resolvable:$true] %s22_s10  ;;  %s42_s13 = int_to_ptr.hbm [resolvable:$true] %s41_s13 }
   0x6   :  { %25 = dma.hbm_to_vmem [thread:$0]  %s21_s8, 128, %s23_s10, [#allocation3]  }
   0x7   :  { %s421_s1 = smov [#allocation6]   ;;  %s55_s17 = sshll.u32 %s516_s3, 4  ;;  %s56_s17 = int_to_ptr.hbm [resolvable:$true] %s55_s17 }
   0x8   :  { %s43_s14 = sshll.u32 %s421_s1, 4  ;;  %s422_s18 = smov 64   ;;  %s44_s14 = int_to_ptr.vmem [resolvable:$true] %s43_s14 }
   0x9   :  { %s423_s0 = smov 4   ;;  %s424_s19 = smov [#allocation7]  }
   0xa   :  { %49 = dma.hbm_to_vmem [thread:$0]  %s42_s13, 192, %s44_s14, [#allocation5], %s422_s18, %s422_s18, %s423_s0  }
   0xb   :  { %s57_s20 = sshll.u32 %s424_s19, 4  ;;  %s58_s20 = int_to_ptr.vmem [resolvable:$true] %s57_s20 }
   0xc   :  { %60 = dma.hbm_to_vmem [thread:$0]  %s56_s17, 64, %s58_s20, [#allocation8]  }
   0xd   :  { %413 = dma.done.wait [#allocation3], 128  }
   0xe   :  { %414 = vsyncadd [#allocation3], 4294967168 }
   0xf   :  { %415 = dma.done.wait [#allocation5], 320  }
  0x10   :  { %416 = vsyncadd [#allocation5], 4294966976 }
  0x11   :  { %417 = dma.done.wait [#allocation8], 64  }
  0x12   :  { %418 = vsyncadd [#allocation8], 4294967232  ;;  %vm99_vm0 = vcmask 1043456   ;;  %v94_v0 = vld [vmem:[#allocation7] sm:$0xf]  ;;  %v86_v1 = vld [vmem:[#allocation4] sm:$0xff] }
  0x13   :  { %v93_v2 = vld [vmem:[#allocation6 + $0x8] sm:$0xf]  ;;  %v101_v3 = vsel %vm99_vm0, %v94_v0, 0  ;;  %v87_v4 = vpack.c.bf16 %v86_v1, %v86_v1  ;;  %vm95_vm1 = vcmask 64512   ;;  %v299_v8 = vld [vmem:[#allocation6] sm:$0xff]  ;;  %v84_v9 = vld [vmem:[#allocation2] sm:$0xff] }
  0x14   :  { %v121_v5 = vunpack.c.l.b16 %v93_v2  ;;  %110 = vmatpush.bf16.msra.mxu0 %v101_v3  ;;  %v85_v10 = vpack.c.bf16 %v84_v9, %v84_v9  ;;  %vm125_vm2 = vcmask 195584   ;;  %v303_v11 = vld [vmem:[%s517_s4 + $0x18] sm:$0xff]  ;;  %v302_v12 = vld [vmem:[%s517_s4 + $0x10] sm:$0xff]  ;;  %v301_v13 = vld [vmem:[%s517_s4 + $0x8] sm:$0xff]  ;;  %vm182_vm3 = vcmask 523264  }
  0x15   :  { %190 = vmatpush.bf16.msra.mxu2 %v303_v11  ;;  %v300_v14 = vld [vmem:[%s517_s4] sm:$0xff]  ;;  %v307_v15 = vld [vmem:[%s518_s5 + $0x18] sm:$0xff]  ;;  %v306_v16 = vld [vmem:[%s518_s5 + $0x10] sm:$0xff]  ;;  %vm250_vm4 = vcmask 15360  }
  0x16   :  { %v123_v6 = vpack.c.b16 %v121_v5, %v121_v5  ;;  %241 = vmatpush.bf16.msra.mxu3 %v307_v15  ;;  %v314_v18 = vld [vmem:[%s519_s6] ss:$0 sm:$0xff]  ;;  %v305_v26 = vld [vmem:[%s518_s5 + $0x8] sm:$0xff]  ;;  %v315_v28 = vld [vmem:[%s519_s6 + $0x1] ss:$0 sm:$0xff] }
  0x17   :  { %259 = vmatmul.msk.bf16.vlgmr.msra.gmra.mxu0 %vm95_vm1, %v87_v4  ;;  %v304_v27 = vld [vmem:[%s518_s5] sm:$0xff] }
  0x18   :  { %v130_v7 = vsel %vm99_vm0, %v123_v6, 0  ;;  %v316_v34 = vld [vmem:[%s519_s6 + $0x2] ss:$0 sm:$0xff] }
  0x19   :  { %138 = vmatpush.bf16.msra.mxu1 %v130_v7  ;;  %191 = vmatpush.bf16.msra.mxu2 %v302_v12 }
  0x1a   :  { %242 = vmatpush.bf16.msra.mxu3 %v306_v16 }
  0x1d   :  { %139 = vmatpush.bf16.msra.mxu1 %v299_v8  ;;  %192 = vmatpush.bf16.msra.mxu2 %v301_v13 }
  0x1e   :  { %243 = vmatpush.bf16.msra.mxu3 %v305_v26 }
  0x20   :  { %264 = vmatmul.msk.bf16.vlgmr.msra.gmra.mxu1 %vm125_vm2, %v85_v10 }
  0x21   :  { %193 = vmatpush.bf16.msra.mxu2 %v300_v14 }
  0x22   :  { %244 = vmatpush.bf16.msra.mxu3 %v304_v27 }
  0x94   :  { %v112_v17 = vpop.f32.mrf.mxu0 }
  0x9c   :  { %v114_v19 = vpop.f32.mrf.mxu0 }
  0x9d   :  { %v141_v20 = vpop.f32.mrf.mxu1 }
  0x9e   :  { %v142_v21 = vadd.f32 %v141_v20, %v112_v17 }
  0xa0   :  { %v146_v22 = vadd.f32 %v314_v18, %v142_v21 }
  0xa2   :  { %v147_v23 = vmax.f32 %v146_v22, 0.0 }
  0xa4   :  { %v148_v24 = vpack.c.bf16 %v147_v23, %v147_v23 }
  0xa5   :  { %v143_v25 = vpop.f32.mrf.mxu1 }
  0xa6   :  { %281 = vmatmul.msk.bf16.vlgmr.msra.gmra.mxu2 %vm182_vm3, %v148_v24 }
 0x129   :  { %v195_v29 = vpop.f32.mrf.mxu2 }
 0x12a   :  { %v196_v30 = vadd.f32 %v315_v28, %v195_v29 }
 0x12c   :  { %v199_v31 = vmax.f32 %v196_v30, 0.0 }
 0x12e   :  { %v200_v32 = vpack.c.bf16 %v199_v31, %v199_v31 }
 0x130   :  { %298 = vmatmul.msk.bf16.vlgmr.msra.gmra.mxu3 %vm182_vm3, %v200_v32 }
 0x131   :  { %v197_v33 = vpop.f32.mrf.mxu2 }
 0x1b3   :  { %v246_v35 = vpop.f32.mrf.mxu3 }
 0x1b4   :  { %v247_v36 = vadd.f32 %v316_v34, %v246_v35 }
 0x1b6   :  { %251 = vst.msk [vmem:[%s520_s7] sm:$0xff] %vm250_vm4, %v247_v36 }
 0x1bb   :  { %v248_v37 = vpop.f32.mrf.mxu3 }
 0x1bc   :  { %256 = vsyncpa [#allocation3], 1 }
 0x1bd   :  { %257 = vsyncpa [#allocation5], 1 }
 0x1be   :  { %258 = vsyncpa [#allocation8], 1 }

</bundles_post_ra>
